<compile_context>
chip_gen: v5e
topology: v5e:2x2
jax: 0.10.0
libtpu: 0.0.40
codegen_flags: <defaults>
</compile_context>

<pallas_src>
import math

import jax
import jax.numpy as jnp
from jax.experimental import pallas as pl
from jax.experimental.pallas import tpu as pltpu

_LANE = 128
# Explicit scoped-VMEM limit: > v5e's 16 MiB default, < v7x's 64 MiB physical.
_VMEM_LIMIT_BYTES = 32 * 1024 * 1024
# ~4 MiB per block (in+out, double-buffered => ~16 MiB VMEM).
_TARGET_BLOCK_BYTES = 4 * 1024 * 1024


def _identity_kernel(x_ref, o_ref):
    # Pure copy of the current VMEM tile.
    o_ref[...] = x_ref[...]


def _cost(n_bytes):
    # Streaming copy: read n bytes + write n bytes, zero arithmetic.
    return pl.CostEstimate(flops=0, transcendentals=0, bytes_accessed=2 * n_bytes)


def _copy_full_block(x2d, n_bytes, alias):
    """Single whole-array block copy. Only used for small tensors (<= ~2 MiB)."""
    kwargs = dict(
        out_shape=jax.ShapeDtypeStruct(x2d.shape, x2d.dtype),
        cost_estimate=_cost(n_bytes),
        compiler_params=pltpu.CompilerParams(vmem_limit_bytes=_VMEM_LIMIT_BYTES),
    )
    if alias:
        kwargs["input_output_aliases"] = {0: 0}
    return pl.pallas_call(_identity_kernel, **kwargs)(x2d)


def _copy_1d_chunked(x2d, n, elem, n_bytes, alias):
    """Pipelined (1, CHUNK) streaming copy for ragged total sizes.

    A 1-row VMEM block is sublane-padded to 8 rows, so the chunk is sized
    against the padded footprint (8 * chunk * elem) to stay well inside the
    scoped VMEM limit while keeping lane-dense, 128-multiple stores.
    """
    chunk = (_TARGET_BLOCK_BYTES // (8 * elem)) // _LANE * _LANE
    chunk = max(_LANE, chunk)
    grid = (pl.cdiv(n, chunk),)  # Pallas masks the ragged last block.
    kwargs = dict(
        out_shape=jax.ShapeDtypeStruct((1, n), x2d.dtype),
        grid_spec=pltpu.PrefetchScalarGridSpec(
            num_scalar_prefetch=0,
            grid=grid,
            in_specs=[pl.BlockSpec((1, chunk), lambda i: (0, i))],
            out_specs=pl.BlockSpec((1, chunk), lambda i: (0, i)),
        ),
        compiler_params=pltpu.CompilerParams(
            dimension_semantics=("parallel",),
            vmem_limit_bytes=_VMEM_LIMIT_BYTES,
        ),
        cost_estimate=_cost(n_bytes),
    )
    if alias:
        kwargs["input_output_aliases"] = {0: 0}
    return pl.pallas_call(_identity_kernel, **kwargs)(x2d)


def identity_layer(x, *, donate=False, materialize=True):
    """Pallas TPU IdentityLayer.forward: returns a tensor equal to x.

    donate=True       -> alias output onto the input HBM buffer (only use when
                         the caller actually donates x; otherwise XLA inserts a
                         defensive copy).
    materialize=False -> zero-traffic identity: return x directly (no kernel).
    """
    if not materialize:
        return x

    orig_shape = x.shape
    n = math.prod(orig_shape) if orig_shape else 1
    if n == 0:
        return x

    elem = jnp.dtype(x.dtype).itemsize
    n_bytes = n * elem

    if n % _LANE != 0:
        # Ragged total size.
        x2d = x.reshape(1, n)
        if n_bytes <= 2 * 1024 * 1024:
            out = _copy_full_block(x2d, n_bytes, donate)
        else:
            out = _copy_1d_chunked(x2d, n, elem, n_bytes, donate)
        return out.reshape(orig_shape)

    # Lane-aligned path: view as a lane-dense 2-D slab [rows, L], L a large
    # multiple of 128 dividing n, for long contiguous DMA rows and unmasked
    # full-width vector stores.
    L = _LANE
    for cand in (4096, 2048, 1024, 512, 256, 128):
        if n % cand == 0:
            L = cand
            break
    rows = n // L
    x2d = x.reshape(rows, L)

    # ~4 MiB per block, rows rounded to the dtype's native sublane packing
    # (f32: 8, bf16: 16, int8/fp8: 32).
    sub = max(8, 32 // elem)
    tile_rows = (_TARGET_BLOCK_BYTES // (L * elem)) // sub * sub
    tile_rows = max(sub, tile_rows)
    if tile_rows >= rows:
        tile_rows = rows  # full-extent dim bypasses the (8,128) rule

    grid = (pl.cdiv(rows, tile_rows),)  # ragged last block handled by Pallas

    kwargs = dict(
        out_shape=jax.ShapeDtypeStruct((rows, L), x2d.dtype),
        grid_spec=pltpu.PrefetchScalarGridSpec(
            num_scalar_prefetch=0,
            grid=grid,
            in_specs=[pl.BlockSpec((tile_rows, L), lambda i: (i, 0))],
            out_specs=pl.BlockSpec((tile_rows, L), lambda i: (i, 0)),
        ),
        compiler_params=pltpu.CompilerParams(
            dimension_semantics=("parallel",),
            vmem_limit_bytes=_VMEM_LIMIT_BYTES,
        ),
        cost_estimate=_cost(n_bytes),
    )
    if donate:
        kwargs["input_output_aliases"] = {0: 0}

    out2d = pl.pallas_call(_identity_kernel, **kwargs)(x2d)
    return out2d.reshape(orig_shape)  # free metadata reshape


if __name__ == "__main__":
    key = jax.random.PRNGKey(0)
    k1, k2 = jax.random.split(key)

    # Small NCHW input consistent with typical usage of IdentityLayer.
    x = jax.random.normal(k1, (2, 4, 16, 16), dtype=jnp.float32)
    y = identity_layer(x)
    jax.block_until_ready(y)
    assert y.shape == x.shape and y.dtype == x.dtype
    assert bool(jnp.all(y == x))

    # Tiny ragged-size input exercises the non-128-multiple fallback.
    x_ragged = jax.random.normal(k2, (5, 7), dtype=jnp.float32)
    y_ragged = identity_layer(x_ragged)
    jax.block_until_ready(y_ragged)
    assert y_ragged.shape == x_ragged.shape and y_ragged.dtype == x_ragged.dtype
    assert bool(jnp.all(y_ragged == x_ragged))

    print("KERNEL_OK")
</pallas_src>

<mosaic_0001>
module attributes {stable_mosaic.version = 11 : i64} {
  func.func @_identity_kernel(%arg0: i32, %arg1: memref<1x2048xf32, #tpu.memory_space<vmem>>, %arg2: memref<1x2048xf32, #tpu.memory_space<vmem>>) attributes {dimension_semantics = [#tpu.dimension_semantics<parallel>], iteration_bounds = array<i64: 1>, scalar_prefetch = 0 : i64, scratch_operands = 0 : i64, tpu.core_type = #tpu.core_type<tc>, window_params = [{transform_indices = @transform_0, window_bounds = array<i64: 1, 2048>}, {transform_indices = @transform_1, window_bounds = array<i64: 1, 2048>}]} {
    %c0 = arith.constant 0 : index
    %c0_0 = arith.constant 0 : index
    %0 = vector.load %arg1[%c0, %c0_0] : memref<1x2048xf32, #tpu.memory_space<vmem>>, vector<1x2048xf32>
    %c0_1 = arith.constant 0 : index
    %c0_2 = arith.constant 0 : index
    %1 = vector.load %arg2[%c0_1, %c0_2] : memref<1x2048xf32, #tpu.memory_space<vmem>>, vector<1x2048xf32>
    tpu.vector_store %arg2[%c0_1, %c0_2], %0 {strides = array<i32>} : memref<1x2048xf32, #tpu.memory_space<vmem>>, vector<1x2048xf32>,
    return
  }
  func.func @transform_0(%arg0: i32) -> (i32, i32) {
    %c0_i32 = arith.constant 0 : i32
    %c0_i32_0 = arith.constant 0 : i32
    return %arg0, %c0_i32 : i32, i32
  }
  func.func @transform_1(%arg0: i32) -> (i32, i32) {
    %c0_i32 = arith.constant 0 : i32
    %c0_i32_0 = arith.constant 0 : i32
    return %arg0, %c0_i32 : i32, i32
  }
}

</mosaic_0001>

<bundles_post_ra>
// kernel: tpu_custom_call.1
= control target key start
LH: loop header
LB: loop body
LE: loop exit
PB: predicated region body
PF: predicated region fallthrough
CT: control target
= control target key end

     0   :  { %6 = vsyncpa [#allocation3], 0  ;;  %s116_s0 = inlined_call_operand.hbm [shape: f32[1,2048], index: 0, kind: input, shape index: {}]   ;;  %s117_s1 = inlined_call_operand.hbm [shape: f32[1,2048], index: 1, kind: output, shape index: {}]  }
   0x1   :  { %7 = vsyncpa [#allocation4], 0  ;;  %s13_s8 = sshll.u32 %s116_s0, 4  ;;  %s98_s9 = smov [#allocation2]   ;;  %s14_s8 = int_to_ptr.hbm [resolvable:$true] %s13_s8 }
   0x2   :  { %s15_s10 = sshll.u32 %s98_s9, 4  ;;  %s16_s10 = int_to_ptr.vmem [resolvable:$true] %s15_s10 }
   0x3   :  { %18 = dma.hbm_to_vmem [thread:$0]  %s14_s8, 256, %s16_s10, [#allocation3]  }
   0x4   :  { %94 = dma.done.wait [#allocation3], 256  }
   0x5   :  { %95 = vsyncadd [#allocation3], 4294967040  ;;  %s99_s11 = smov [#allocation5]   ;;  %s34_s15 = sshll.u32 %s117_s1, 4  ;;  %v23_v0 = vld [vmem:[#allocation2] sm:$0xff]  ;;  %v24_v1 = vld [vmem:[#allocation2 + $0x8] sm:$0xff]  ;;  %s35_s15 = int_to_ptr.hbm [resolvable:$true] %s34_s15 }
   0x6   :  { %s32_s12 = sshll.u32 %s99_s11, 4  ;;  %25 = vst [vmem:[#allocation5] sm:$0xff] %v23_v0  ;;  %s33_s12 = int_to_ptr.vmem [resolvable:$true] %s32_s12 }
   0x7   :  { %26 = vst [vmem:[#allocation5 + $0x8] sm:$0xff] %v24_v1 }
   0x8   :  { %37 = dma.vmem_to_hbm [thread:$0]  %s33_s12, 256, %s35_s15, [#allocation4]  }
   0x9   :  { %96 = dma.done.wait [#allocation4], 256  }
   0xa   :  { %97 = vsyncadd [#allocation4], 4294967040 }
   0xb   :  { %42 = vsyncpa [#allocation3], 1 }
   0xc   :  { %43 = vsyncpa [#allocation4], 1 }

</bundles_post_ra>
